<compile_context>
chip_gen: v7x
topology: tpu7x:2x2x1
jax: 0.10.0
libtpu: 0.0.40
codegen_flags: <defaults>
</compile_context>

<pallas_src>
import jax
import jax.numpy as jnp
from jax.experimental import pallas as pl
from jax.experimental.pallas import tpu as pltpu


def facial_detect_kernel(x_ref, wb_ref, bb_ref, wfc_ref, bfc_ref,
                         wh_ref, bh_ref, o_ref):
    # x_ref: (TB, C, HW) — spatial positions on the lane axis.
    # Global average pool: the 1/HW scale is folded into wb, so a plain sum
    # (lane reduce on the XLU) is enough.
    pooled = jnp.sum(x_ref[...], axis=-1)                               # (TB, C) f32

    # Synthetic backbone projection (stand-in for frozen Inception features,
    # which are post-ReLU and therefore non-negative).
    feats = jnp.dot(pooled.astype(jnp.bfloat16), wb_ref[...],
                    preferred_element_type=jnp.float32) + bb_ref[...]   # (TB, F)
    feats = jnp.maximum(feats, 0.0)

    # Replaced model.fc : Linear(num_ftrs, 512)   (no activation, as in torch)
    hid = jnp.dot(feats.astype(jnp.bfloat16), wfc_ref[...],
                  preferred_element_type=jnp.float32) + bfc_ref[...]    # (TB, 512)

    # head_1 : Linear(512, num_classes_padded) followed by ReLU
    out = jnp.dot(hid.astype(jnp.bfloat16), wh_ref[...],
                  preferred_element_type=jnp.float32) + bh_ref[...]     # (TB, NCp)
    o_ref[...] = jnp.maximum(out, 0.0).astype(o_ref.dtype)


def facial_detect_forward(x_nchw, params, *, tb=None):
    """x_nchw: (B, C, H, W) float32, PyTorch layout.  Returns (B, num_classes)."""
    wb, bb, wfc, bfc, wh, bh = params
    B, C, H, W = x_nchw.shape
    HW = H * W
    num_ftrs = wb.shape[1]
    hidden = wfc.shape[1]
    num_classes = wh.shape[1]

    # Lane-dense output: pad classes up to a multiple of 128 (slice back later).
    nc_pad = max(128, ((num_classes + 127) // 128) * 128)

    # Batch tile: at least 8 (sublane), at most 128 (MXU M) — pad B to a multiple.
    if tb is None:
        tb = min(128, max(8, ((B + 7) // 8) * 8))
    b_pad = pl.cdiv(B, tb) * tb

    # NCHW -> (B, C, HW): no transpose, spatial on lanes.
    x = x_nchw.reshape(B, C, HW)
    if b_pad != B:
        x = jnp.pad(x, ((0, b_pad - B), (0, 0), (0, 0)))

    # Weight prep (done once outside the kernel):
    #  * fold 1/HW pooling scale into wb,
    #  * bf16 weights for the MXU (halves weight DMA bytes),
    #  * pad head weight/bias out to nc_pad lanes.
    wb_k = (wb * (1.0 / HW)).astype(jnp.bfloat16)
    wfc_k = wfc.astype(jnp.bfloat16)
    wh_k = jnp.pad(wh, ((0, 0), (0, nc_pad - num_classes))).astype(jnp.bfloat16)
    bb_k = bb.astype(jnp.float32)
    bfc_k = bfc.astype(jnp.float32)
    bh_k = jnp.pad(bh, ((0, 0), (0, nc_pad - num_classes))).astype(jnp.float32)

    # VMEM budget: double-buffered x/out tiles + resident params + headroom.
    x_tile_bytes = tb * C * HW * 4
    out_tile_bytes = tb * nc_pad * 4
    param_bytes = (wb_k.size + wfc_k.size + wh_k.size) * 2 \
                + (bb_k.size + bfc_k.size + bh_k.size) * 4
    vmem_limit = 2 * x_tile_bytes + 2 * out_tile_bytes + 2 * param_bytes + (4 << 20)
    vmem_limit = int(min(max(vmem_limit, 16 << 20), 64 << 20))

    # Scheduler hint for XLA around the custom call.
    flops = 2 * b_pad * (C * num_ftrs + num_ftrs * hidden + hidden * nc_pad)
    bytes_accessed = (x.size * 4 + param_bytes + b_pad * nc_pad * 4)
    cost = pl.CostEstimate(flops=flops, transcendentals=0,
                           bytes_accessed=bytes_accessed)

    grid_spec = pltpu.PrefetchScalarGridSpec(
        num_scalar_prefetch=0,
        grid=(b_pad // tb,),
        in_specs=[
            pl.BlockSpec((tb, C, HW), lambda i: (i, 0, 0)),   # batch-tiled input
            pl.BlockSpec(wb_k.shape, lambda i: (0, 0)),       # weights stay resident
            pl.BlockSpec(bb_k.shape, lambda i: (0, 0)),
            pl.BlockSpec(wfc_k.shape, lambda i: (0, 0)),
            pl.BlockSpec(bfc_k.shape, lambda i: (0, 0)),
            pl.BlockSpec(wh_k.shape, lambda i: (0, 0)),
            pl.BlockSpec(bh_k.shape, lambda i: (0, 0)),
        ],
        out_specs=pl.BlockSpec((tb, nc_pad), lambda i: (i, 0)),
    )

    out = pl.pallas_call(
        facial_detect_kernel,
        out_shape=jax.ShapeDtypeStruct((b_pad, nc_pad), jnp.float32),
        grid_spec=grid_spec,
        compiler_params=pltpu.CompilerParams(
            dimension_semantics=("parallel",),
            vmem_limit_bytes=vmem_limit),
        cost_estimate=cost,
    )(x, wb_k, bb_k, wfc_k, bfc_k, wh_k, bh_k)

    return out[:B, :num_classes]


def facial_detect_reference(x_nchw, params):
    """Pure-JAX (f32) reference of the fused path, for a sanity check."""
    wb, bb, wfc, bfc, wh, bh = params
    B, C, H, W = x_nchw.shape
    pooled = jnp.mean(x_nchw.reshape(B, C, H * W), axis=-1)
    feats = jnp.maximum(pooled @ wb + bb, 0.0)
    hid = feats @ wfc + bfc
    return jnp.maximum(hid @ wh + bh, 0.0)


def init_params(key, in_channels, num_ftrs, hidden, num_classes):
    ks = jax.random.split(key, 6)
    wb = jax.random.normal(ks[0], (in_channels, num_ftrs), jnp.float32) * 0.05
    bb = jax.random.normal(ks[1], (1, num_ftrs), jnp.float32) * 0.01
    wfc = jax.random.normal(ks[2], (num_ftrs, hidden), jnp.float32) * 0.05
    bfc = jax.random.normal(ks[3], (1, hidden), jnp.float32) * 0.01
    wh = jax.random.normal(ks[4], (hidden, num_classes), jnp.float32) * 0.05
    bh = jax.random.normal(ks[5], (1, num_classes), jnp.float32) * 0.01
    return wb, bb, wfc, bfc, wh, bh


if __name__ == "__main__":
    key = jax.random.PRNGKey(0)
    k_x, k_p = jax.random.split(key)

    # Small shapes consistent with the forward pass:
    #   input image batch (B, C, H, W), synthetic num_ftrs, fc hidden 512,
    #   num_classes = 136 (68 facial keypoints * 2).
    B, C, H, W = 2, 4, 16, 16
    NUM_FTRS = 256
    HIDDEN = 512
    NUM_CLASSES = 136

    x = jax.random.normal(k_x, (B, C, H, W), jnp.float32)
    params = init_params(k_p, C, NUM_FTRS, HIDDEN, NUM_CLASSES)

    out = facial_detect_forward(x, params)
    out = jax.block_until_ready(out)

    assert out.shape == (B, NUM_CLASSES), out.shape
    assert bool(jnp.all(out >= 0.0)), "ReLU output must be non-negative"

    # Loose-tolerance check against the f32 reference (kernel uses bf16 MXU
    # operands with f32 accumulation).
    ref = facial_detect_reference(x, params)
    assert bool(jnp.allclose(out, ref, rtol=1e-1, atol=1e-2)), \
        float(jnp.max(jnp.abs(out - ref)))

    print("KERNEL_OK")
</pallas_src>

<mosaic_0001>
module attributes {stable_mosaic.version = 11 : i64} {
  func.func @facial_detect_kernel(%arg0: i32, %arg1: memref<8x4x256xf32, #tpu.memory_space<vmem>>, %arg2: memref<4x256xbf16, #tpu.memory_space<vmem>>, %arg3: memref<1x256xf32, #tpu.memory_space<vmem>>, %arg4: memref<256x512xbf16, #tpu.memory_space<vmem>>, %arg5: memref<1x512xf32, #tpu.memory_space<vmem>>, %arg6: memref<512x256xbf16, #tpu.memory_space<vmem>>, %arg7: memref<1x256xf32, #tpu.memory_space<vmem>>, %arg8: memref<8x256xf32, #tpu.memory_space<vmem>>) attributes {dimension_semantics = [#tpu.dimension_semantics<parallel>], iteration_bounds = array<i64: 1>, scalar_prefetch = 0 : i64, scratch_operands = 0 : i64, tpu.core_type = #tpu.core_type<tc>, window_params = [{transform_indices = @transform_0, window_bounds = array<i64: 8, 4, 256>}, {pipeline_mode = #tpu.pipeline_mode<synchronous>, transform_indices = @transform_1, window_bounds = array<i64: 4, 256>}, {pipeline_mode = #tpu.pipeline_mode<synchronous>, transform_indices = @transform_2, window_bounds = array<i64: 1, 256>}, {pipeline_mode = #tpu.pipeline_mode<synchronous>, transform_indices = @transform_3, window_bounds = array<i64: 256, 512>}, {pipeline_mode = #tpu.pipeline_mode<synchronous>, transform_indices = @transform_4, window_bounds = array<i64: 1, 512>}, {pipeline_mode = #tpu.pipeline_mode<synchronous>, transform_indices = @transform_5, window_bounds = array<i64: 512, 256>}, {pipeline_mode = #tpu.pipeline_mode<synchronous>, transform_indices = @transform_6, window_bounds = array<i64: 1, 256>}, {transform_indices = @transform_7, window_bounds = array<i64: 8, 256>}]} {
    %c0 = arith.constant 0 : index
    %c0_0 = arith.constant 0 : index
    %c0_1 = arith.constant 0 : index
    %0 = vector.load %arg1[%c0, %c0_0, %c0_1] : memref<8x4x256xf32, #tpu.memory_space<vmem>>, vector<8x4x256xf32>
    %cst = arith.constant dense<0.000000e+00> : vector<8x4xf32>
    %1 = vector.multi_reduction <add>, %0, %cst [2] : vector<8x4x256xf32> to vector<8x4xf32>
    %2 = arith.truncf %1 : vector<8x4xf32> to vector<8x4xbf16>
    %c0_2 = arith.constant 0 : index
    %c0_3 = arith.constant 0 : index
    %3 = vector.load %arg2[%c0_2, %c0_3] : memref<4x256xbf16, #tpu.memory_space<vmem>>, vector<4x256xbf16>
    %cst_4 = arith.constant dense<0.000000e+00> : vector<8x256xf32>
    %4 = tpu.matmul %2, %3, %cst_4 {dimension_numbers = #tpu.dot_dimension_numbers<[1], [0], [0], [1], [0, 0, 1, 1], [], []>} : vector<8x4xbf16>, vector<4x256xbf16>, vector<8x256xf32> -> vector<8x256xf32>
    %c0_5 = arith.constant 0 : index
    %c0_6 = arith.constant 0 : index
    %5 = vector.load %arg3[%c0_5, %c0_6] : memref<1x256xf32, #tpu.memory_space<vmem>>, vector<1x256xf32>
    %6 = vector.broadcast %5 : vector<1x256xf32> to vector<8x256xf32>
    %7 = arith.addf %4, %6 : vector<8x256xf32>
    %cst_7 = arith.constant 0.000000e+00 : f32
    %8 = vector.broadcast %cst_7 : f32 to vector<8x256xf32>
    %9 = arith.maximumf %7, %8 : vector<8x256xf32>
    %10 = arith.truncf %9 : vector<8x256xf32> to vector<8x256xbf16>
    %c0_8 = arith.constant 0 : index
    %c0_9 = arith.constant 0 : index
    %11 = vector.load %arg4[%c0_8, %c0_9] : memref<256x512xbf16, #tpu.memory_space<vmem>>, vector<256x512xbf16>
    %cst_10 = arith.constant dense<0.000000e+00> : vector<8x512xf32>
    %12 = tpu.matmul %10, %11, %cst_10 {dimension_numbers = #tpu.dot_dimension_numbers<[1], [0], [0], [1], [0, 0, 1, 1], [], []>} : vector<8x256xbf16>, vector<256x512xbf16>, vector<8x512xf32> -> vector<8x512xf32>
    %c0_11 = arith.constant 0 : index
    %c0_12 = arith.constant 0 : index
    %13 = vector.load %arg5[%c0_11, %c0_12] : memref<1x512xf32, #tpu.memory_space<vmem>>, vector<1x512xf32>
    %14 = vector.broadcast %13 : vector<1x512xf32> to vector<8x512xf32>
    %15 = arith.addf %12, %14 : vector<8x512xf32>
    %16 = arith.truncf %15 : vector<8x512xf32> to vector<8x512xbf16>
    %c0_13 = arith.constant 0 : index
    %c0_14 = arith.constant 0 : index
    %17 = vector.load %arg6[%c0_13, %c0_14] : memref<512x256xbf16, #tpu.memory_space<vmem>>, vector<512x256xbf16>
    %cst_15 = arith.constant dense<0.000000e+00> : vector<8x256xf32>
    %18 = tpu.matmul %16, %17, %cst_15 {dimension_numbers = #tpu.dot_dimension_numbers<[1], [0], [0], [1], [0, 0, 1, 1], [], []>} : vector<8x512xbf16>, vector<512x256xbf16>, vector<8x256xf32> -> vector<8x256xf32>
    %c0_16 = arith.constant 0 : index
    %c0_17 = arith.constant 0 : index
    %19 = vector.load %arg7[%c0_16, %c0_17] : memref<1x256xf32, #tpu.memory_space<vmem>>, vector<1x256xf32>
    %20 = vector.broadcast %19 : vector<1x256xf32> to vector<8x256xf32>
    %21 = arith.addf %18, %20 : vector<8x256xf32>
    %cst_18 = arith.constant 0.000000e+00 : f32
    %22 = vector.broadcast %cst_18 : f32 to vector<8x256xf32>
    %23 = arith.maximumf %21, %22 : vector<8x256xf32>
    %c0_19 = arith.constant 0 : index
    %c0_20 = arith.constant 0 : index
    %24 = vector.load %arg8[%c0_19, %c0_20] : memref<8x256xf32, #tpu.memory_space<vmem>>, vector<8x256xf32>
    tpu.vector_store %arg8[%c0_19, %c0_20], %23 {strides = array<i32>} : memref<8x256xf32, #tpu.memory_space<vmem>>, vector<8x256xf32>,
    return
  }
  func.func @transform_0(%arg0: i32) -> (i32, i32, i32) {
    %c0_i32 = arith.constant 0 : i32
    %c0_i32_0 = arith.constant 0 : i32
    %c0_i32_1 = arith.constant 0 : i32
    return %arg0, %c0_i32, %c0_i32_0 : i32, i32, i32
  }
  func.func @transform_1(%arg0: i32) -> (i32, i32) {
    %c0_i32 = arith.constant 0 : i32
    %c0_i32_0 = arith.constant 0 : i32
    %c0_i32_1 = arith.constant 0 : i32
    return %c0_i32, %c0_i32_0 : i32, i32
  }
  func.func @transform_2(%arg0: i32) -> (i32, i32) {
    %c0_i32 = arith.constant 0 : i32
    %c0_i32_0 = arith.constant 0 : i32
    %c0_i32_1 = arith.constant 0 : i32
    return %c0_i32, %c0_i32_0 : i32, i32
  }
  func.func @transform_3(%arg0: i32) -> (i32, i32) {
    %c0_i32 = arith.constant 0 : i32
    %c0_i32_0 = arith.constant 0 : i32
    %c0_i32_1 = arith.constant 0 : i32
    return %c0_i32, %c0_i32_0 : i32, i32
  }
  func.func @transform_4(%arg0: i32) -> (i32, i32) {
    %c0_i32 = arith.constant 0 : i32
    %c0_i32_0 = arith.constant 0 : i32
    %c0_i32_1 = arith.constant 0 : i32
    return %c0_i32, %c0_i32_0 : i32, i32
  }
  func.func @transform_5(%arg0: i32) -> (i32, i32) {
    %c0_i32 = arith.constant 0 : i32
    %c0_i32_0 = arith.constant 0 : i32
    %c0_i32_1 = arith.constant 0 : i32
    return %c0_i32, %c0_i32_0 : i32, i32
  }
  func.func @transform_6(%arg0: i32) -> (i32, i32) {
    %c0_i32 = arith.constant 0 : i32
    %c0_i32_0 = arith.constant 0 : i32
    %c0_i32_1 = arith.constant 0 : i32
    return %c0_i32, %c0_i32_0 : i32, i32
  }
  func.func @transform_7(%arg0: i32) -> (i32, i32) {
    %c0_i32 = arith.constant 0 : i32
    %c0_i32_0 = arith.constant 0 : i32
    return %arg0, %c0_i32 : i32, i32
  }
}

</mosaic_0001>

<bundles_post_ra>
// kernel: tpu_custom_call.1
= control target key start
LH: loop header
LB: loop body
LE: loop exit
PB: predicated region body
PF: predicated region fallthrough
CT: control target
= control target key end

     0   :  { %12 = vsyncpa [#allocation3], 0  ;;  %s1936_s0 = inlined_call_operand.hbm [shape: f32[8,4,256], index: 0, kind: input, shape index: {}]   ;;  %s1937_s1 = inlined_call_operand.hbm [shape: bf16[4,256], index: 1, kind: input, shape index: {}]   ;;  %s1938_s2 = inlined_call_operand.vmem [shape: f32[1,256], index: 2, kind: input, shape index: {}]   ;;  %s1939_s3 = inlined_call_operand.hbm [shape: bf16[256,512], index: 3, kind: input, shape index: {}]   ;;  %s1940_s4 = inlined_call_operand.vmem [shape: f32[1,512], index: 4, kind: input, shape index: {}]   ;;  %s1941_s5 = inlined_call_operand.hbm [shape: bf16[512,256], index: 5, kind: input, shape index: {}]   ;;  %s1942_s6 = inlined_call_operand.vmem [shape: f32[1,256], index: 6, kind: input, shape index: {}]   ;;  %s1943_s7 = inlined_call_operand.hbm [shape: f32[8,256], index: 7, kind: output, shape index: {}]  }
   0x1   :  { %13 = vsyncpa [#allocation6], 0 }
   0x2   :  { %14 = vsyncpa [#allocation9], 0 }
   0x3   :  { %15 = vsyncpa [#allocation4], 0  ;;  %s1761_s24 = smov [#allocation5]   ;;  %s1762_s26 = smov [#allocation2]  }
   0x4   :  { %s34_s25 = sshll.u32 %s1761_s24, 4  ;;  %s21_s27 = sshll.u32 %s1762_s26, 4  ;;  %s35_s25 = int_to_ptr.vmem [resolvable:$true] %s34_s25  ;;  %s1811_s27 = int_to_ptr.vmem [resolvable:$true] %s21_s27 }
   0x5   :  { %s1643_s30 = scalar_lea.hbm %s1937_s1, 64 }
   0x6   :  { %p1644_p0 = scmp.ne.s32.totalorder %s1937_s1, %s1643_s30  ;;  %p1647_p1 = scmp.lt.u32.totalorder %s1643_s30, %s1937_s1 }
   0x8   :  { %p1649_p2 = pnand %p1647_p1, %p1644_p0 }
   0xa   :  { %1652 = shalt.err (!%p1649_p2)
}
   0xb   :  { %s1653_s12 = scalar_lea.vmem %s35_s25, 64  ;;  %p1658_p4 = scmp.lt.s32.totalorder %s35_s25, %s35_s25 }
   0xc   :  { %p1654_p3 = scmp.ne.s32.totalorder %s35_s25, %s1653_s12  ;;  %p1659_p5 = scmp.lt.s32.totalorder %s1653_s12, %s1653_s12 }
   0xe   :  { %p1660_p6 = por %p1659_p5, %p1658_p4 }
  0x10   :  { %p1661_p7 = pnand %p1660_p6, %p1654_p3 }
  0x12   :  { %1664 = shalt.err (!%p1661_p7)
}
  0x13   :  { %37 = dma.hbm_to_vmem [thread:$0]  %s1937_s1, 64, %s35_s25, [#allocation6]  }
  0x14   :  { %s1665_s17 = scalar_lea.hbm %s1936_s0, 1024 }
  0x15   :  { %p1666_p8 = scmp.ne.s32.totalorder %s1936_s0, %s1665_s17  ;;  %p1669_p9 = scmp.lt.u32.totalorder %s1665_s17, %s1936_s0 }
  0x17   :  { %p1671_p10 = pnand %p1669_p9, %p1666_p8 }
  0x19   :  { %1674 = shalt.err (!%p1671_p10)
}
  0x1a   :  { %s1675_s22 = scalar_lea.vmem %s1811_s27, 1024  ;;  %p1680_p12 = scmp.lt.s32.totalorder %s1811_s27, %s1811_s27 }
  0x1b   :  { %p1676_p11 = scmp.ne.s32.totalorder %s1811_s27, %s1675_s22  ;;  %p1681_p13 = scmp.lt.s32.totalorder %s1675_s22, %s1675_s22 }
  0x1d   :  { %p1682_p0 = por %p1681_p13, %p1680_p12 }
  0x1f   :  { %p1683_p1 = pnand %p1682_p0, %p1676_p11 }
  0x21   :  { %1686 = shalt.err (!%p1683_p1)
}
  0x22   :  { %s1763_s1 = smov 128   ;;  %s1764_s23 = smov 8  }
  0x23   :  { %27 = dma.hbm_to_vmem [thread:$0]  %s1936_s0, 1024, %s1811_s27, [#allocation3], %s1763_s1, %s1763_s1, %s1764_s23  }
  0x24   :  { %s1765_s26 = smov [#allocation7]   ;;  %s1687_s8 = scalar_lea.hbm %s1939_s3, 8192 }
  0x25   :  { %s45_s28 = sshll.u32 %s1765_s26, 4  ;;  %p1688_p2 = scmp.ne.s32.totalorder %s1939_s3, %s1687_s8  ;;  %s46_s28 = int_to_ptr.vmem [resolvable:$true] %s45_s28 }
  0x26   :  { %p1691_p3 = scmp.lt.u32.totalorder %s1687_s8, %s1939_s3 }
  0x28   :  { %p1693_p4 = pnand %p1691_p3, %p1688_p2 }
  0x2a   :  { %1696 = shalt.err (!%p1693_p4)
}
  0x2b   :  { %s1697_s13 = scalar_lea.vmem %s46_s28, 8192  ;;  %p1702_p6 = scmp.lt.s32.totalorder %s46_s28, %s46_s28 }
  0x2c   :  { %p1698_p5 = scmp.ne.s32.totalorder %s46_s28, %s1697_s13  ;;  %p1703_p7 = scmp.lt.s32.totalorder %s1697_s13, %s1697_s13 }
  0x2e   :  { %p1704_p8 = por %p1703_p7, %p1702_p6 }
  0x30   :  { %p1705_p9 = pnand %p1704_p8, %p1698_p5 }
  0x32   :  { %1708 = shalt.err (!%p1705_p9)
}
  0x33   :  { %s1766_s0 = smov 256   ;;  %s1767_s27 = smov 16  }
  0x34   :  { %51 = dma.hbm_to_vmem [thread:$0]  %s1939_s3, 8192, %s46_s28, [#allocation6], %s1766_s0, %s1766_s0, %s1767_s27  }
  0x35   :  { %s1768_s16 = smov [#allocation8]   ;;  %s1709_s20 = scalar_lea.hbm %s1941_s5, 8192 }
  0x36   :  { %s59_s17 = sshll.u32 %s1768_s16, 4  ;;  %p1710_p10 = scmp.ne.s32.totalorder %s1941_s5, %s1709_s20  ;;  %s60_s17 = int_to_ptr.vmem [resolvable:$true] %s59_s17 }
  0x37   :  { %p1713_p11 = scmp.lt.u32.totalorder %s1709_s20, %s1941_s5 }
  0x39   :  { %p1715_p12 = pnand %p1713_p11, %p1710_p10 }
  0x3b   :  { %1718 = shalt.err (!%p1715_p12)
}
  0x3c   :  { %s1719_s26 = scalar_lea.vmem %s60_s17, 8192  ;;  %p1724_p0 = scmp.lt.s32.totalorder %s60_s17, %s60_s17 }
  0x3d   :  { %p1720_p13 = scmp.ne.s32.totalorder %s60_s17, %s1719_s26  ;;  %p1725_p1 = scmp.lt.s32.totalorder %s1719_s26, %s1719_s26 }
  0x3f   :  { %p1726_p2 = por %p1725_p1, %p1724_p0 }
  0x41   :  { %p1727_p3 = pnand %p1726_p2, %p1720_p13 }
  0x43   :  { %1730 = shalt.err (!%p1727_p3)
}
  0x44   :  { %65 = dma.hbm_to_vmem [thread:$0]  %s1941_s5, 8192, %s60_s17, [#allocation9], %s1763_s1, %s1763_s1, %s1764_s23  }
  0x45   :  { %1753 = dma.done.wait [#allocation3], 1024  }
  0x46   :  { %1754 = vsyncadd [#allocation3], 4294966272 }
  0x47   :  { %1755 = dma.done.wait [#allocation6], 8256  }
  0x48   :  { %1756 = vsyncadd [#allocation6], 4294959040 }
  0x49   :  { %1757 = dma.done.wait [#allocation9], 8192  }
  0x4a   :  { %1758 = vsyncadd [#allocation9], 4294959104  ;;  %vm113_vm0 = vcmask 1043456   ;;  %v81_v0 = vld [vmem:[#allocation2] sm:$0xff]  ;;  %v83_v1 = vld [vmem:[#allocation2 + $0x10] sm:$0xff]  ;;  %vm253_vm1 = vcmask 1041408   ;;  %v165_v45 = vlaneseq }
  0x4b   :  { %v82_v2 = vld [vmem:[#allocation2 + $0x8] sm:$0xff]  ;;  %v97_v3 = vcombine.high %v81_v0, %v81_v0  ;;  %v114_v4 = vsel %vm113_vm0, %v81_v0, 0.0  ;;  %v99_v5 = vcombine.high %v83_v1, %v83_v1  ;;  %v124_v6 = vsel %vm113_vm0, %v83_v1, 0.0  ;;  %v84_v7 = vld [vmem:[#allocation2 + $0x18] sm:$0xff]  ;;  %v85_v8 = vld [vmem:[#allocation2 + $0x20] sm:$0xff]  ;;  %s1770_s30 = smov [#allocation10]  }
  0x4c   :  { %v86_v9 = vld [vmem:[#allocation2 + $0x28] sm:$0xff]  ;;  %v98_v10 = vcombine.high %v82_v2, %v82_v2  ;;  %v119_v11 = vsel %vm113_vm0, %v82_v2, 0.0  ;;  %v100_v12 = vcombine.high %v84_v7, %v84_v7  ;;  %v87_v13 = vld [vmem:[#allocation2 + $0x30] sm:$0xff]  ;;  %v88_v14 = vld [vmem:[#allocation2 + $0x38] sm:$0xff]  ;;  %v129_v17 = vsel %vm113_vm0, %v84_v7, 0.0  ;;  %s1285_s8 = sshll.u32 %s1770_s30, 4  ;;  %s1286_s8 = int_to_ptr.vmem [resolvable:$true] %s1285_s8 }
  0x4d   :  { %v115_v15 = vsel %vm113_vm0, %v97_v3, 0.0  ;;  %v125_v16 = vsel %vm113_vm0, %v99_v5, 0.0  ;;  %v101_v18 = vcombine.high %v85_v8, %v85_v8  ;;  %v102_v23 = vcombine.high %v86_v9, %v86_v9  ;;  %v1296_v40 = vld.sshfl [vmem:[#allocation5] sm:$0x33 pattern:$0x76325410]  ;;  %p1736_p5 = scmp.lt.s32.totalorder %s1286_s8, %s1286_s8 }
  0x4e   :  { %v116_v19 = vadd.f32 %v115_v15, %v114_v4  ;;  %v126_v20 = vadd.f32 %v125_v16, %v124_v6  ;;  %v120_v21 = vsel %vm113_vm0, %v98_v10, 0.0  ;;  %v130_v22 = vsel %vm113_vm0, %v100_v12, 0.0  ;;  %v1453_v44 = vld [vmem:[#allocation7 + $0x4] ss:$16 sps:$4 sm:$0xff]   ;;  %s1731_s9 = scalar_lea.vmem %s1286_s8, 256 }
  0x4f   :  { %v121_v24 = vadd.f32 %v120_v21, %v119_v11  ;;  %v131_v25 = vadd.f32 %v130_v22, %v129_v17  ;;  %v134_v26 = vsel %vm113_vm0, %v85_v8, 0.0  ;;  %v135_v27 = vsel %vm113_vm0, %v101_v18, 0.0  ;;  %p1732_p4 = scmp.ne.s32.totalorder %s1286_s8, %s1731_s9  ;;  %p1737_p6 = scmp.lt.s32.totalorder %s1731_s9, %s1731_s9 }
  0x50   :  { %117 = vadd.xlane.f32.xlu0 %v116_v19  ;;  %127 = vadd.xlane.f32.xlu1 %v126_v20  ;;  %v139_v28 = vsel %vm113_vm0, %v86_v9, 0.0  ;;  %v140_v29 = vsel %vm113_vm0, %v102_v23, 0.0  ;;  %v103_v30 = vcombine.high %v87_v13, %v87_v13  ;;  %v104_v31 = vcombine.high %v88_v14, %v88_v14 }
  0x51   :  { %v136_v32 = vadd.f32 %v135_v27, %v134_v26  ;;  %v141_v33 = vadd.f32 %v140_v29, %v139_v28  ;;  %v144_v34 = vsel %vm113_vm0, %v87_v13, 0.0  ;;  %v149_v36 = vsel %vm113_vm0, %v88_v14, 0.0  ;;  %v1456_v26 = vld [vmem:[#allocation7 + $0x24] ss:$16 sps:$4 sm:$0xff]   ;;  %v1454_v27 = vld [vmem:[#allocation7 + $0x20] ss:$16 sps:$4 sm:$0xff]   ;;  %p1738_p7 = por %p1737_p6, %p1736_p5 }
  0x52   :  { %v145_v35 = vsel %vm113_vm0, %v103_v30, 0.0  ;;  %v150_v37 = vsel %vm113_vm0, %v104_v31, 0.0  ;;  %v248_v41 = vcombine.high %v1296_v40, %v1296_v40  ;;  %v255_v42 = vsel %vm253_vm1, %v1296_v40, 0  ;;  %v1459_v28 = vld [vmem:[#allocation7 + $0x44] ss:$16 sps:$4 sm:$0xff]  }
  0x53   :  { %v146_v38 = vadd.f32 %v145_v35, %v144_v34  ;;  %v151_v39 = vadd.f32 %v150_v37, %v149_v36  ;;  %v1769_v43 = vmov 0   ;;  %v1888_v46 = vshrl.u32 %v165_v45, 7  ;;  %v1457_v29 = vld [vmem:[#allocation7 + $0x40] ss:$16 sps:$4 sm:$0xff]   ;;  %v1462_v30 = vld [vmem:[#allocation7 + $0x64] ss:$16 sps:$4 sm:$0xff]   ;;  %p1739_p8 = pnand %p1738_p7, %p1732_p4 }
  0x54   :  { %122 = vadd.xlane.f32.xlu0 %v121_v24  ;;  %132 = vadd.xlane.f32.xlu1 %v131_v25  ;;  %v192_v47 = vand.u32 127, %v165_v45  ;;  %vm225_vm2 = vcmask 1041409   ;;  %vm227_vm3 = vcmask 1042434   ;;  %vm229_vm4 = vcmask 1043459   ;;  %v1451_v24 = vld [vmem:[#allocation7] ss:$16 sps:$4 sm:$0xff]  }
  0x55   :  { %1297 = vmatprep.subr.msk.bf16.mxu0 %vm253_vm1, %v248_v41  ;;  %292 = vmatprep.mubr.bf16.mxu0 %v1769_v43  ;;  %vm231_vm5 = vcmask 1044484   ;;  %vm233_vm6 = vcmask 1045509   ;;  %vm235_vm7 = vcmask 1046534   ;;  %vm237_vm8 = vcmask 1047559   ;;  %v1460_v31 = vld [vmem:[#allocation7 + $0x60] ss:$16 sps:$4 sm:$0xff]  }
  0x56   :  { %261 = vmatpush1.bf16.msra.mxu0 %v255_v42  ;;  %v195_v52 = vsub.s32 %v192_v47, %v1888_v46  ;;  %vm249_vm9 = vcmask 31744   ;;  %v1468_v34 = vld [vmem:[#allocation7 + $0xa4] ss:$16 sps:$4 sm:$0xff]   ;;  %v1466_v35 = vld [vmem:[#allocation7 + $0xa0] ss:$16 sps:$4 sm:$0xff]  }
  0x57   :  { %711 = vmatprep.subr.bf16.mxu0 %v1453_v44  ;;  %v1471_v36 = vld [vmem:[#allocation7 + $0xc4] ss:$16 sps:$4 sm:$0xff]   ;;  %v1469_v37 = vld [vmem:[#allocation7 + $0xc0] ss:$16 sps:$4 sm:$0xff]  }
  0x58   :  { %137 = vadd.xlane.f32.xlu0 %v136_v32  ;;  %142 = vadd.xlane.f32.xlu1 %v141_v33  ;;  %v1465_v32 = vld [vmem:[#allocation7 + $0x84] ss:$16 sps:$4 sm:$0xff]   ;;  %v1463_v33 = vld [vmem:[#allocation7 + $0x80] ss:$16 sps:$4 sm:$0xff]  }
  0x59   :  { %v1477_v40 = vld [vmem:[#allocation7 + $0x104] ss:$16 sps:$4 sm:$0xff]   ;;  %v1475_v41 = vld [vmem:[#allocation7 + $0x100] ss:$16 sps:$4 sm:$0xff]  }
  0x5a   :  { %v1480_v42 = vld [vmem:[#allocation7 + $0x124] ss:$16 sps:$4 sm:$0xff]   ;;  %v1478_v43 = vld [vmem:[#allocation7 + $0x120] ss:$16 sps:$4 sm:$0xff]  }
  0x5b   :  { %v1483_v44 = vld [vmem:[#allocation7 + $0x144] ss:$16 sps:$4 sm:$0xff]   ;;  %v1481_v45 = vld [vmem:[#allocation7 + $0x140] ss:$16 sps:$4 sm:$0xff]  }
  0x5c   :  { %147 = vadd.xlane.f32.xlu0 %v146_v38  ;;  %152 = vadd.xlane.f32.xlu1 %v151_v39  ;;  %v1474_v38 = vld [vmem:[#allocation7 + $0xe4] ss:$16 sps:$4 sm:$0xff]   ;;  %v1472_v39 = vld [vmem:[#allocation7 + $0xe0] ss:$16 sps:$4 sm:$0xff]  }
  0x5d   :  { %v1486_v47 = vld [vmem:[#allocation7 + $0x164] ss:$16 sps:$4 sm:$0xff]  }
  0xdd   :  { %v118_v48 = vpop.xlane.xlu0 %117  ;;  %v128_v49 = vpop.xlane.xlu1 %127 }
  0xde   :  { %v154_v50 = vpack.c.bf16 %v118_v48, %v118_v48  ;;  %v156_v51 = vpack.c.bf16 %v128_v49, %v128_v49  ;;  %v1484_v48 = vld [vmem:[#allocation7 + $0x160] ss:$16 sps:$4 sm:$0xff]   ;;  %v1489_v49 = vld [vmem:[#allocation7 + $0x184] ss:$16 sps:$4 sm:$0xff]  }
  0xe0   :  { %v183_v53 = vunpack.c.l.b16 %v154_v50  ;;  %v185_v58 = vunpack.c.l.b16 %v156_v51  ;;  %v1487_v50 = vld [vmem:[#allocation7 + $0x180] ss:$16 sps:$4 sm:$0xff]   ;;  %v1492_v51 = vld [vmem:[#allocation7 + $0x1a4] ss:$16 sps:$4 sm:$0xff]  }
  0xe1   :  { %v123_v54 = vpop.xlane.xlu0 %122  ;;  %v133_v55 = vpop.xlane.xlu1 %132 }
  0xe2   :  { %v155_v56 = vpack.c.bf16 %v123_v54, %v123_v54  ;;  %v157_v57 = vpack.c.bf16 %v133_v55, %v133_v55  ;;  %v196_v61 = vrot.slane %v183_v53, %v195_v52  ;;  %v204_v4 = vrot.slane %v185_v58, %v195_v52  ;;  %v1495_v53 = vld [vmem:[#allocation7 + $0x1c4] ss:$16 sps:$4 sm:$0xff]   ;;  %v1493_v54 = vld [vmem:[#allocation7 + $0x1c0] ss:$16 sps:$4 sm:$0xff]  }
  0xe3   :  { %v1498_v55 = vld [vmem:[#allocation7 + $0x1e4] ss:$16 sps:$4 sm:$0xff]  }
  0xe4   :  { %v184_v59 = vunpack.c.l.b16 %v155_v56  ;;  %v186_v60 = vunpack.c.l.b16 %v157_v57  ;;  %v1496_v56 = vld [vmem:[#allocation7 + $0x1e0] ss:$16 sps:$4 sm:$0xff]   ;;  %v1501_v57 = vld [vmem:[#allocation7 + $0xc] ss:$16 sps:$4 sm:$0xff]  }
  0xe5   :  { %v138_v62 = vpop.xlane.xlu0 %137  ;;  %v143_v63 = vpop.xlane.xlu1 %142  ;;  %v1547_v58 = vld [vmem:[#allocation8 + $0x4] ss:$8 sps:$4 sm:$0xff]  }
  0xe6   :  { %v200_v0 = vrot.slane %v184_v59, %v195_v52  ;;  %v208_v1 = vrot.slane %v186_v60, %v195_v52  ;;  %v158_v2 = vpack.c.bf16 %v138_v62, %v138_v62  ;;  %v159_v3 = vpack.c.bf16 %v143_v63, %v143_v63  ;;  %v1549_v59 = vld [vmem:[#allocation8] ss:$8 sps:$4 sm:$0xff]   ;;  %v1550_v60 = vld [vmem:[#allocation8 + $0x14] ss:$8 sps:$4 sm:$0xff]   ;;  %1193 = vmatprep.subr.bf16.mxu1 %v1547_v58  ;;  %v1553_v62 = vld [vmem:[#allocation8 + $0x24] ss:$8 sps:$4 sm:$0xff]  }
  0xe7   :  { %1194 = vmatpush1.bf16.msra.mxu1 %v1549_v59  ;;  %v1555_v63 = vld [vmem:[#allocation8 + $0x20] ss:$8 sps:$4 sm:$0xff]   ;;  %v1531_v59 = vld [vmem:[#allocation7 + $0x14c] ss:$16 sps:$4 sm:$0xff]  }
  0xe8   :  { %v226_v5 = vsel %vm225_vm2, %v200_v0, %v196_v61  ;;  %v187_v6 = vunpack.c.l.b16 %v158_v2  ;;  %v188_v7 = vunpack.c.l.b16 %v159_v3  ;;  %v1552_v61 = vld [vmem:[#allocation8 + $0x10] ss:$8 sps:$4 sm:$0xff]   ;;  %1195 = vmatprep.subr.bf16.mxu1 %v1550_v60  ;;  %v1556_v0 = vld [vmem:[#allocation8 + $0x34] ss:$8 sps:$4 sm:$0xff]   ;;  %v1559_v2 = vld [vmem:[#allocation8 + $0x44] ss:$8 sps:$4 sm:$0xff]  }
  0xe9   :  { %v228_v8 = vsel %vm227_vm3, %v204_v4, %v226_v5  ;;  %v148_v9 = vpop.xlane.xlu0 %147  ;;  %v153_v10 = vpop.xlane.xlu1 %152  ;;  %v1561_v3 = vld [vmem:[#allocation8 + $0x40] ss:$8 sps:$4 sm:$0xff]   ;;  %v1562_v4 = vld [vmem:[#allocation8 + $0x54] ss:$8 sps:$4 sm:$0xff]   ;;  %v1564_v5 = vld [vmem:[#allocation8 + $0x50] ss:$8 sps:$4 sm:$0xff]  }
  0xea   :  { %v230_v11 = vsel %vm229_vm4, %v208_v1, %v228_v8  ;;  %v212_v12 = vrot.slane %v187_v6, %v195_v52  ;;  %v160_v13 = vpack.c.bf16 %v148_v9, %v148_v9  ;;  %v216_v14 = vrot.slane %v188_v7, %v195_v52  ;;  %v1558_v1 = vld [vmem:[#allocation8 + $0x30] ss:$8 sps:$4 sm:$0xff]   ;;  %v1565_v6 = vld [vmem:[#allocation8 + $0x64] ss:$8 sps:$4 sm:$0xff]   ;;  %v1567_v7 = vld [vmem:[#allocation8 + $0x60] ss:$8 sps:$4 sm:$0xff]  }
  0xeb   :  { %v161_v15 = vpack.c.bf16 %v153_v10, %v153_v10  ;;  %1196 = vmatpush1.bf16.msra.mxu1 %v1552_v61  ;;  %v1568_v8 = vld [vmem:[#allocation8 + $0x74] ss:$8 sps:$4 sm:$0xff]   ;;  %v1570_v9 = vld [vmem:[#allocation8 + $0x70] ss:$8 sps:$4 sm:$0xff]   ;;  %v1571_v10 = vld [vmem:[#allocation8 + $0x84] ss:$8 sps:$4 sm:$0xff]  }
  0xec   :  { %v232_v16 = vsel %vm231_vm5, %v212_v12, %v230_v11  ;;  %v189_v17 = vunpack.c.l.b16 %v160_v13  ;;  %1197 = vmatprep.subr.bf16.mxu1 %v1553_v62  ;;  %v1573_v11 = vld [vmem:[#allocation8 + $0x80] ss:$8 sps:$4 sm:$0xff]   ;;  %v1574_v12 = vld [vmem:[#allocation8 + $0x94] ss:$8 sps:$4 sm:$0xff]   ;;  %v1576_v13 = vld [vmem:[#allocation8 + $0x90] ss:$8 sps:$4 sm:$0xff]  }
  0xed   :  { %v190_v18 = vunpack.c.l.b16 %v161_v15  ;;  %v234_v20 = vsel %vm233_vm6, %v216_v14, %v232_v16  ;;  %v1577_v14 = vld [vmem:[#allocation8 + $0xa4] ss:$8 sps:$4 sm:$0xff]   ;;  %v1579_v15 = vld [vmem:[#allocation8 + $0xa0] ss:$8 sps:$4 sm:$0xff]   ;;  %v1580_v16 = vld [vmem:[#allocation8 + $0xb4] ss:$8 sps:$4 sm:$0xff]  }
  0xee   :  { %v220_v19 = vrot.slane %v189_v17, %v195_v52  ;;  %v1582_v17 = vld [vmem:[#allocation8 + $0xb0] ss:$8 sps:$4 sm:$0xff]   ;;  %v1534_v61 = vld [vmem:[#allocation7 + $0x16c] ss:$16 sps:$4 sm:$0xff]  }
  0xef   :  { %v224_v21 = vrot.slane %v190_v18, %v195_v52  ;;  %v1490_v52 = vld [vmem:[#allocation7 + $0x1a0] ss:$16 sps:$4 sm:$0xff]   ;;  %1198 = vmatpush1.bf16.msra.mxu1 %v1555_v63  ;;  %v1583_v18 = vld [vmem:[#allocation8 + $0xc4] ss:$8 sps:$4 sm:$0xff]   ;;  %v1526_v58 = vld [vmem:[#allocation7 + $0x128] ss:$16 sps:$4 sm:$0xff]  }
  0xf0   :  { %v236_v22 = vsel %vm235_vm7, %v220_v19, %v234_v20  ;;  %1199 = vmatprep.subr.bf16.mxu1 %v1556_v0  ;;  %v1585_v19 = vld [vmem:[#allocation8 + $0xc0] ss:$8 sps:$4 sm:$0xff]   ;;  %v1892_v20 = vsub.s32 0, %v1888_v46  ;;  %v1537_v63 = vld [vmem:[#allocation7 + $0x18c] ss:$16 sps:$4 sm:$0xff]  }
  0xf1   :  { %v238_v23 = vsel %vm237_vm8, %v224_v21, %v236_v22  ;;  %v1586_v21 = vld [vmem:[#allocation8 + $0xd4] ss:$8 sps:$4 sm:$0xff]   ;;  %v1529_v60 = vld [vmem:[#allocation7 + $0x148] ss:$16 sps:$4 sm:$0xff]  }
  0xf2   :  { %v239_v25 = vpack.c.b16 %v238_v23, %v238_v23  ;;  %v163_v22 = vld [vmem:[%s1938_s2] sm:$0x3]  ;;  %v1898_v23 = vsub.s32 1, %v1888_v46  ;;  %v1532_v62 = vld [vmem:[#allocation7 + $0x168] ss:$16 sps:$4 sm:$0xff]  }
  0xf3   :  { %1200 = vmatpush1.bf16.msra.mxu1 %v1558_v1  ;;  %v1535_v0 = vld [vmem:[#allocation7 + $0x188] ss:$16 sps:$4 sm:$0xff]   ;;  %v1540_v1 = vld [vmem:[#allocation7 + $0x1ac] ss:$16 sps:$4 sm:$0xff]  }
  0xf4   :  { %1298 = vmatmul.mubr.msk.bf16.vlgmr.msra.gmra.mrb[0].mxu0 %vm249_vm9, %v239_v25  ;;  %1201 = vmatprep.subr.bf16.mxu1 %v1559_v2  ;;  %v168_v25 = vrot.slane %v163_v22, %v1892_v20  ;;  %v1538_v2 = vld [vmem:[#allocation7 + $0x1a8] ss:$16 sps:$4 sm:$0xff]  }
  0xf5   :  { %712 = vmatpush1.bf16.msra.mxu0 %v1451_v24  ;;  %v1588_v24 = vld [vmem:[#allocation8 + $0xd0] ss:$8 sps:$4 sm:$0xff]  }
  0xf6   :  { %713 = vmatprep.subr.bf16.mxu0 %v1456_v26  ;;  %v1589_v26 = vld [vmem:[#allocation8 + $0xe4] ss:$8 sps:$4 sm:$0xff]  }
  0xf7   :  { %1202 = vmatpush1.bf16.msra.mxu1 %v1561_v3  ;;  %v1543_v3 = vld [vmem:[#allocation7 + $0x1cc] ss:$16 sps:$4 sm:$0xff]  }
  0xf8   :  { %1203 = vmatprep.subr.bf16.mxu1 %v1562_v4  ;;  %v1541_v4 = vld [vmem:[#allocation7 + $0x1c8] ss:$16 sps:$4 sm:$0xff]  }
  0xf9   :  { %714 = vmatpush1.bf16.msra.mxu0 %v1454_v27  ;;  %v172_v27 = vrot.slane %v163_v22, %v1898_v23 }
  0xfa   :  { %715 = vmatprep.subr.bf16.mxu0 %v1459_v28 }
  0xfb   :  { %1204 = vmatpush1.bf16.msra.mxu1 %v1564_v5  ;;  %v1546_v5 = vld [vmem:[#allocation7 + $0x1ec] ss:$16 sps:$4 sm:$0xff]  }
  0xfc   :  { %1205 = vmatprep.subr.bf16.mxu1 %v1565_v6  ;;  %v1544_v6 = vld [vmem:[#allocation7 + $0x1e8] ss:$16 sps:$4 sm:$0xff]  }
  0xfd   :  { %716 = vmatpush1.bf16.msra.mxu0 %v1457_v29  ;;  %v1591_v29 = vld [vmem:[#allocation8 + $0xe0] ss:$8 sps:$4 sm:$0xff]  }
  0xfe   :  { %717 = vmatprep.subr.bf16.mxu0 %v1462_v30 }
  0xff   :  { %1206 = vmatpush1.bf16.msra.mxu1 %v1567_v7  ;;  %v1592_v7 = vld [vmem:[#allocation8 + $0xf4] ss:$8 sps:$4 sm:$0xff]  }
 0x100   :  { %1207 = vmatprep.subr.bf16.mxu1 %v1568_v8  ;;  %v1594_v8 = vld [vmem:[#allocation8 + $0xf0] ss:$8 sps:$4 sm:$0xff]  }
 0x101   :  { %718 = vmatpush1.bf16.msra.mxu0 %v1460_v31 }
 0x102   :  { %719 = vmatprep.subr.bf16.mxu0 %v1465_v32 }
 0x103   :  { %1208 = vmatpush1.bf16.msra.mxu1 %v1570_v9  ;;  %v1597_v9 = vld [vmem:[#allocation8 + $0x104] ss:$8 sps:$4 sm:$0xff]  }
 0x104   :  { %1209 = vmatprep.subr.bf16.mxu1 %v1571_v10  ;;  %v1909_v10 = vld [vmem:[%s1940_s4] sm:$0xf] }
 0x105   :  { %720 = vmatpush1.bf16.msra.mxu0 %v1463_v33 }
 0x106   :  { %721 = vmatprep.subr.bf16.mxu0 %v1468_v34 }
 0x107   :  { %1210 = vmatpush1.bf16.msra.mxu1 %v1573_v11  ;;  %v374_v11 = vrot.slane %v1909_v10, %v1892_v20 }
 0x108   :  { %1211 = vmatprep.subr.bf16.mxu1 %v1574_v12  ;;  %v378_v12 = vrot.slane %v1909_v10, %v1898_v23 }
 0x109   :  { %722 = vmatpush1.bf16.msra.mxu0 %v1466_v35 }
 0x10a   :  { %723 = vmatprep.subr.bf16.mxu0 %v1471_v36 }
 0x10b   :  { %1212 = vmatpush1.bf16.msra.mxu1 %v1576_v13 }
 0x10c   :  { %1213 = vmatprep.subr.bf16.mxu1 %v1577_v14 }
 0x10d   :  { %724 = vmatpush1.bf16.msra.mxu0 %v1469_v37 }
 0x10e   :  { %725 = vmatprep.subr.bf16.mxu0 %v1474_v38  ;;  %v1499_v38 = vld [vmem:[#allocation7 + $0x8] ss:$16 sps:$4 sm:$0xff]  }
 0x10f   :  { %1214 = vmatpush1.bf16.msra.mxu1 %v1579_v15 }
 0x110   :  { %1215 = vmatprep.subr.bf16.mxu1 %v1580_v16 }
 0x111   :  { %726 = vmatpush1.bf16.msra.mxu0 %v1472_v39 }
 0x112   :  { %727 = vmatprep.subr.bf16.mxu0 %v1477_v40  ;;  %v1504_v40 = vld [vmem:[#allocation7 + $0x2c] ss:$16 sps:$4 sm:$0xff]  }
 0x113   :  { %1216 = vmatpush1.bf16.msra.mxu1 %v1582_v17 }
 0x114   :  { %1217 = vmatprep.subr.bf16.mxu1 %v1583_v18 }
 0x115   :  { %728 = vmatpush1.bf16.msra.mxu0 %v1475_v41  ;;  %v1502_v41 = vld [vmem:[#allocation7 + $0x28] ss:$16 sps:$4 sm:$0xff]  }
 0x116   :  { %729 = vmatprep.subr.bf16.mxu0 %v1480_v42  ;;  %v1507_v42 = vld [vmem:[#allocation7 + $0x4c] ss:$16 sps:$4 sm:$0xff]  }
 0x117   :  { %1218 = vmatpush1.bf16.msra.mxu1 %v1585_v19 }
 0x118   :  { %1219 = vmatprep.subr.bf16.mxu1 %v1586_v21  ;;  %v1595_v21 = vld [vmem:[#allocation8 + $0x100] ss:$8 sps:$4 sm:$0xff]  }
 0x119   :  { %730 = vmatpush1.bf16.msra.mxu0 %v1478_v43  ;;  %v1505_v43 = vld [vmem:[#allocation7 + $0x48] ss:$16 sps:$4 sm:$0xff]  }
 0x11a   :  { %731 = vmatprep.subr.bf16.mxu0 %v1483_v44  ;;  %v1510_v44 = vld [vmem:[#allocation7 + $0x6c] ss:$16 sps:$4 sm:$0xff]  }
 0x11b   :  { %1220 = vmatpush1.bf16.msra.mxu1 %v1588_v24  ;;  %v1600_v24 = vld [vmem:[#allocation8 + $0x114] ss:$8 sps:$4 sm:$0xff]  }
 0x11c   :  { %1221 = vmatprep.subr.bf16.mxu1 %v1589_v26  ;;  %v1603_v26 = vld [vmem:[#allocation8 + $0x124] ss:$8 sps:$4 sm:$0xff]  }
 0x11d   :  { %732 = vmatpush1.bf16.msra.mxu0 %v1481_v45  ;;  %v1508_v45 = vld [vmem:[#allocation7 + $0x68] ss:$16 sps:$4 sm:$0xff]  }
 0x11e   :  { %733 = vmatprep.subr.bf16.mxu0 %v1486_v47  ;;  %v1513_v47 = vld [vmem:[#allocation7 + $0x8c] ss:$16 sps:$4 sm:$0xff]  }
 0x11f   :  { %1222 = vmatpush1.bf16.msra.mxu1 %v1591_v29  ;;  %v1604_v29 = vld [vmem:[#allocation8 + $0x130] ss:$8 sps:$4 sm:$0xff]  }
 0x120   :  { %1223 = vmatprep.subr.bf16.mxu1 %v1592_v7 }
 0x121   :  { %734 = vmatpush1.bf16.msra.mxu0 %v1484_v48  ;;  %v1511_v48 = vld [vmem:[#allocation7 + $0x88] ss:$16 sps:$4 sm:$0xff]  }
 0x122   :  { %735 = vmatprep.subr.bf16.mxu0 %v1489_v49  ;;  %v1516_v49 = vld [vmem:[#allocation7 + $0xac] ss:$16 sps:$4 sm:$0xff]  }
 0x123   :  { %1224 = vmatpush1.bf16.msra.mxu1 %v1594_v8 }
 0x124   :  { %1234 = vmatprep.subr.bf16.mxu1 %v1597_v9 }
 0x125   :  { %736 = vmatpush1.bf16.msra.mxu0 %v1487_v50  ;;  %v1514_v50 = vld [vmem:[#allocation7 + $0xa8] ss:$16 sps:$4 sm:$0xff]  }
 0x126   :  { %737 = vmatprep.subr.bf16.mxu0 %v1492_v51  ;;  %v1519_v51 = vld [vmem:[#allocation7 + $0xcc] ss:$16 sps:$4 sm:$0xff]  }
 0x129   :  { %738 = vmatpush1.bf16.msra.mxu0 %v1490_v52  ;;  %v1517_v52 = vld [vmem:[#allocation7 + $0xc8] ss:$16 sps:$4 sm:$0xff]  }
 0x12a   :  { %739 = vmatprep.subr.bf16.mxu0 %v1495_v53  ;;  %v1522_v53 = vld [vmem:[#allocation7 + $0xec] ss:$16 sps:$4 sm:$0xff]  }
 0x12d   :  { %740 = vmatpush1.bf16.msra.mxu0 %v1493_v54  ;;  %v1520_v54 = vld [vmem:[#allocation7 + $0xe8] ss:$16 sps:$4 sm:$0xff]  }
 0x12e   :  { %741 = vmatprep.subr.bf16.mxu0 %v1498_v55  ;;  %v1525_v55 = vld [vmem:[#allocation7 + $0x10c] ss:$16 sps:$4 sm:$0xff]  }
 0x131   :  { %742 = vmatpush1.bf16.msra.mxu0 %v1496_v56  ;;  %v1523_v56 = vld [vmem:[#allocation7 + $0x108] ss:$16 sps:$4 sm:$0xff]  }
 0x132   :  { %752 = vmatprep.subr.bf16.mxu0 %v1501_v57  ;;  %v1528_v57 = vld [vmem:[#allocation7 + $0x12c] ss:$16 sps:$4 sm:$0xff]  }
 0x1c7   :  { %v294_v28 = vpop.f32.mrb[0].mxu0 }
 0x1c8   :  { %v295_v30 = vadd.f32 %v294_v28, %v168_v25  ;;  %v296_v31 = vpop.f32.mrb[1].mxu0  ;;  %v1598_v25 = vld [vmem:[#allocation8 + $0x110] ss:$8 sps:$4 sm:$0xff]   ;;  %v1606_v28 = vld [vmem:[#allocation8 + $0x134] ss:$8 sps:$4 sm:$0xff]  }
 0x1c9   :  { %v297_v32 = vadd.f32 %v296_v31, %v172_v27  ;;  %v298_v33 = vpop.f32.mrb[2].mxu0  ;;  %v1601_v27 = vld [vmem:[#allocation8 + $0x120] ss:$8 sps:$4 sm:$0xff]  }
 0x1ca   :  { %v301_v34 = vmax.f32 %v295_v30, 0.0  ;;  %v299_v35 = vpop.f32.mrb[3].mxu0  ;;  %v1609_v30 = vld [vmem:[#allocation8 + $0x144] ss:$8 sps:$4 sm:$0xff]   ;;  %v1607_v31 = vld [vmem:[#allocation8 + $0x140] ss:$8 sps:$4 sm:$0xff]  }
 0x1cb   :  { %v302_v36 = vmax.f32 %v297_v32, 0.0  ;;  %v1612_v32 = vld [vmem:[#allocation8 + $0x154] ss:$8 sps:$4 sm:$0xff]   ;;  %v1610_v33 = vld [vmem:[#allocation8 + $0x150] ss:$8 sps:$4 sm:$0xff]  }
 0x1cc   :  { %v1902_v39 = vpack.c.bf16 %v301_v34, %v301_v34  ;;  %v1615_v34 = vld [vmem:[#allocation8 + $0x164] ss:$8 sps:$4 sm:$0xff]   ;;  %v1613_v35 = vld [vmem:[#allocation8 + $0x160] ss:$8 sps:$4 sm:$0xff]  }
 0x1cd   :  { %v304_v37 = vpack.c.bf16 %v302_v36, %v302_v36  ;;  %v1618_v36 = vld [vmem:[#allocation8 + $0x174] ss:$8 sps:$4 sm:$0xff]  }
 0x1cf   :  { %743 = vmatprep.mubr.bf16.mxu0 %v304_v37 }
 0x1d0   :  { %744 = vmatmul.mubr.bf16.vlgmr.msra.gmra.mrb[4].mxu0 %v1902_v39 }
 0x1d1   :  { %753 = vmatpush1.bf16.msra.mxu0 %v1499_v38  ;;  %784 = vmatprep.mubr.bf16.mxu0 %v304_v37  ;;  %v1616_v37 = vld [vmem:[#allocation8 + $0x170] ss:$8 sps:$4 sm:$0xff]   ;;  %v1621_v38 = vld [vmem:[#allocation8 + $0x184] ss:$8 sps:$4 sm:$0xff]  }
 0x1d2   :  { %754 = vmatprep.subr.bf16.mxu0 %v1504_v40  ;;  %v1624_v40 = vld [vmem:[#allocation8 + $0x194] ss:$8 sps:$4 sm:$0xff]  }
 0x1d5   :  { %755 = vmatpush1.bf16.msra.mxu0 %v1502_v41  ;;  %v1622_v41 = vld [vmem:[#allocation8 + $0x190] ss:$8 sps:$4 sm:$0xff]  }
 0x1d6   :  { %756 = vmatprep.subr.bf16.mxu0 %v1507_v42  ;;  %v1627_v42 = vld [vmem:[#allocation8 + $0x1a4] ss:$8 sps:$4 sm:$0xff]  }
 0x1d9   :  { %757 = vmatpush1.bf16.msra.mxu0 %v1505_v43  ;;  %v1625_v43 = vld [vmem:[#allocation8 + $0x1a0] ss:$8 sps:$4 sm:$0xff]  }
 0x1da   :  { %758 = vmatprep.subr.bf16.mxu0 %v1510_v44  ;;  %v1630_v44 = vld [vmem:[#allocation8 + $0x1b4] ss:$8 sps:$4 sm:$0xff]  }
 0x1dd   :  { %759 = vmatpush1.bf16.msra.mxu0 %v1508_v45  ;;  %v1628_v45 = vld [vmem:[#allocation8 + $0x1b0] ss:$8 sps:$4 sm:$0xff]  }
 0x1de   :  { %760 = vmatprep.subr.bf16.mxu0 %v1513_v47  ;;  %v1633_v47 = vld [vmem:[#allocation8 + $0x1c4] ss:$8 sps:$4 sm:$0xff]  }
 0x1e1   :  { %761 = vmatpush1.bf16.msra.mxu0 %v1511_v48  ;;  %v1631_v48 = vld [vmem:[#allocation8 + $0x1c0] ss:$8 sps:$4 sm:$0xff]  }
 0x1e2   :  { %762 = vmatprep.subr.bf16.mxu0 %v1516_v49  ;;  %v1636_v49 = vld [vmem:[#allocation8 + $0x1d4] ss:$8 sps:$4 sm:$0xff]  }
 0x1e5   :  { %763 = vmatpush1.bf16.msra.mxu0 %v1514_v50  ;;  %v1634_v50 = vld [vmem:[#allocation8 + $0x1d0] ss:$8 sps:$4 sm:$0xff]  }
 0x1e6   :  { %764 = vmatprep.subr.bf16.mxu0 %v1519_v51  ;;  %v1639_v51 = vld [vmem:[#allocation8 + $0x1e4] ss:$8 sps:$4 sm:$0xff]  }
 0x1e9   :  { %765 = vmatpush1.bf16.msra.mxu0 %v1517_v52  ;;  %v381_v52 = vsub.s32 2, %v1888_v46 }
 0x1ea   :  { %766 = vmatprep.subr.bf16.mxu0 %v1522_v53  ;;  %v385_v53 = vsub.s32 3, %v1888_v46 }
 0x1ed   :  { %767 = vmatpush1.bf16.msra.mxu0 %v1520_v54  ;;  %v1637_v54 = vld [vmem:[#allocation8 + $0x1e0] ss:$8 sps:$4 sm:$0xff]  }
 0x1ee   :  { %768 = vmatprep.subr.bf16.mxu0 %v1525_v55  ;;  %v382_v55 = vrot.slane %v1909_v10, %v381_v52 }
 0x1f1   :  { %769 = vmatpush1.bf16.msra.mxu0 %v1523_v56  ;;  %v1642_v56 = vld [vmem:[#allocation8 + $0x1f4] ss:$8 sps:$4 sm:$0xff]  }
 0x1f2   :  { %770 = vmatprep.subr.bf16.mxu0 %v1528_v57  ;;  %v386_v57 = vrot.slane %v1909_v10, %v385_v53 }
 0x1f5   :  { %771 = vmatpush1.bf16.msra.mxu0 %v1526_v58 }
 0x1f6   :  { %772 = vmatprep.subr.bf16.mxu0 %v1531_v59  ;;  %v1640_v59 = vld [vmem:[#allocation8 + $0x1f0] ss:$8 sps:$4 sm:$0xff]  }
 0x1f9   :  { %773 = vmatpush1.bf16.msra.mxu0 %v1529_v60 }
 0x1fa   :  { %774 = vmatprep.subr.bf16.mxu0 %v1534_v61 }
 0x1fd   :  { %775 = vmatpush1.bf16.msra.mxu0 %v1532_v62 }
 0x1fe   :  { %776 = vmatprep.subr.bf16.mxu0 %v1537_v63 }
 0x201   :  { %777 = vmatpush1.bf16.msra.mxu0 %v1535_v0 }
 0x202   :  { %778 = vmatprep.subr.bf16.mxu0 %v1540_v1 }
 0x205   :  { %779 = vmatpush1.bf16.msra.mxu0 %v1538_v2  ;;  %v861_v2 = vld [vmem:[%s1942_s6] sm:$0x3] }
 0x206   :  { %780 = vmatprep.subr.bf16.mxu0 %v1543_v3  ;;  %v866_v3 = vrot.slane %v861_v2, %v1892_v20 }
 0x209   :  { %781 = vmatpush1.bf16.msra.mxu0 %v1541_v4  ;;  %v870_v4 = vrot.slane %v861_v2, %v1898_v23 }
 0x20a   :  { %782 = vmatprep.subr.bf16.mxu0 %v1546_v5 }
 0x20d   :  { %783 = vmatpush1.bf16.msra.mxu0 %v1544_v6 }
 0x210   :  { %785 = vmatmul.mubr.bf16.vlgmr.msra.gmra.mrb[8].mxu0 %v1902_v39  ;;  %v1619_v39 = vld [vmem:[#allocation8 + $0x180] ss:$8 sps:$4 sm:$0xff]  }
 0x2a3   :  { %v745_v13 = vpop.f32.mrb[4].mxu0 }
 0x2a4   :  { %v746_v14 = vadd.f32 %v745_v13, %v374_v11  ;;  %v747_v15 = vpop.f32.mrb[5].mxu0 }
 0x2a5   :  { %v749_v16 = vpop.f32.mrb[6].mxu0  ;;  %v748_v17 = vadd.f32 %v747_v15, %v378_v12 }
 0x2a6   :  { %v750_v18 = vpop.f32.mrb[7].mxu0  ;;  %v793_v22 = vpack.c.bf16 %v746_v14, %v746_v14 }
 0x2a7   :  { %v794_v19 = vpack.c.bf16 %v748_v17, %v748_v17 }
 0x2a9   :  { %1225 = vmatprep.mubr.bf16.mxu1 %v794_v19 }
 0x2aa   :  { %1226 = vmatmul.mubr.bf16.vlgmr.msra.gmra.mrb[0].mxu1 %v793_v22 }
 0x2ab   :  { %1235 = vmatpush1.bf16.msra.mxu1 %v1595_v21 }
 0x2ac   :  { %1236 = vmatprep.subr.bf16.mxu1 %v1600_v24 }
 0x2af   :  { %1237 = vmatpush1.bf16.msra.mxu1 %v1598_v25 }
 0x2b0   :  { %1238 = vmatprep.subr.bf16.mxu1 %v1603_v26 }
 0x2b3   :  { %1239 = vmatpush1.bf16.msra.mxu1 %v1601_v27 }
 0x2b4   :  { %1240 = vmatprep.subr.bf16.mxu1 %v1606_v28 }
 0x2b7   :  { %1241 = vmatpush1.bf16.msra.mxu1 %v1604_v29 }
 0x2b8   :  { %1242 = vmatprep.subr.bf16.mxu1 %v1609_v30 }
 0x2bb   :  { %1243 = vmatpush1.bf16.msra.mxu1 %v1607_v31 }
 0x2bc   :  { %1244 = vmatprep.subr.bf16.mxu1 %v1612_v32 }
 0x2bf   :  { %1245 = vmatpush1.bf16.msra.mxu1 %v1610_v33 }
 0x2c0   :  { %1246 = vmatprep.subr.bf16.mxu1 %v1615_v34 }
 0x2c3   :  { %1247 = vmatpush1.bf16.msra.mxu1 %v1613_v35 }
 0x2c4   :  { %1248 = vmatprep.subr.bf16.mxu1 %v1618_v36 }
 0x2c7   :  { %1249 = vmatpush1.bf16.msra.mxu1 %v1616_v37 }
 0x2c8   :  { %1250 = vmatprep.subr.bf16.mxu1 %v1621_v38 }
 0x2cb   :  { %1251 = vmatpush1.bf16.msra.mxu1 %v1619_v39 }
 0x2cc   :  { %1252 = vmatprep.subr.bf16.mxu1 %v1624_v40 }
 0x2cf   :  { %1253 = vmatpush1.bf16.msra.mxu1 %v1622_v41 }
 0x2d0   :  { %1254 = vmatprep.subr.bf16.mxu1 %v1627_v42 }
 0x2d3   :  { %1255 = vmatpush1.bf16.msra.mxu1 %v1625_v43 }
 0x2d4   :  { %1256 = vmatprep.subr.bf16.mxu1 %v1630_v44 }
 0x2d7   :  { %1257 = vmatpush1.bf16.msra.mxu1 %v1628_v45 }
 0x2d8   :  { %1258 = vmatprep.subr.bf16.mxu1 %v1633_v47 }
 0x2db   :  { %1259 = vmatpush1.bf16.msra.mxu1 %v1631_v48 }
 0x2dc   :  { %1260 = vmatprep.subr.bf16.mxu1 %v1636_v49 }
 0x2df   :  { %1261 = vmatpush1.bf16.msra.mxu1 %v1634_v50 }
 0x2e0   :  { %1262 = vmatprep.subr.bf16.mxu1 %v1639_v51 }
 0x2e3   :  { %v786_v58 = vpop.f32.mrb[8].mxu0  ;;  %1263 = vmatpush1.bf16.msra.mxu1 %v1637_v54 }
 0x2e4   :  { %v787_v60 = vadd.f32 %v786_v58, %v382_v55  ;;  %v788_v61 = vpop.f32.mrb[9].mxu0  ;;  %1264 = vmatprep.subr.bf16.mxu1 %v1642_v56 }
 0x2e5   :  { %v789_v62 = vadd.f32 %v788_v61, %v386_v57  ;;  %v790_v63 = vpop.f32.mrb[10].mxu0 }
 0x2e6   :  { %v791_v0 = vpop.f32.mrb[11].mxu0  ;;  %v795_v46 = vpack.c.bf16 %v787_v60, %v787_v60 }
 0x2e7   :  { %v796_v1 = vpack.c.bf16 %v789_v62, %v789_v62  ;;  %1265 = vmatpush1.bf16.msra.mxu1 %v1640_v59 }
 0x2e9   :  { %1266 = vmatprep.mubr.bf16.mxu1 %v796_v1 }
 0x2ea   :  { %1267 = vmatmul.mubr.bf16.vlgmr.msra.gmra.mrb[0].mxu1 %v795_v46 }
 0x3bd   :  { %v1268_v5 = vpop.f32.mrb[0].mxu1 }
 0x3be   :  { %v1427_v6 = vadd.f32 %v1268_v5, %v866_v3  ;;  %v1270_v7 = vpop.f32.mrb[1].mxu1 }
 0x3bf   :  { %v1428_v8 = vadd.f32 %v1270_v7, %v870_v4  ;;  %v1272_v9 = vpop.f32.mrb[2].mxu1 }
 0x3c0   :  { %v1275_v10 = vmax.f32 %v1427_v6, 0.0  ;;  %v1273_v11 = vpop.f32.mrb[3].mxu1 }
 0x3c1   :  { %v1276_v12 = vmax.f32 %v1428_v8, 0.0 }
 0x3c2   :  { %1277 = vst [vmem:[#allocation10] sm:$0xff] %v1275_v10 }
 0x3c3   :  { %1278 = vst [vmem:[#allocation10 + $0x8] sm:$0xff] %v1276_v12 }
 0x3c4   :  { %1742 = shalt.err (!%p1739_p8)
}
 0x3c5   :  { %s1743_s11 = scalar_lea.hbm %s1943_s7, 256 }
 0x3c6   :  { %p1744_p9 = scmp.ne.s32.totalorder %s1943_s7, %s1743_s11  ;;  %p1747_p10 = scmp.lt.u32.totalorder %s1743_s11, %s1943_s7 }
 0x3c8   :  { %p1749_p11 = pnand %p1747_p10, %p1744_p9 }
 0x3ca   :  { %1752 = shalt.err (!%p1749_p11)
}
 0x3cb   :  { %1288 = dma.vmem_to_hbm [thread:$0]  %s1286_s8, 256, %s1943_s7, [#allocation4]  }
 0x3cc   :  { %1759 = dma.done.wait [#allocation4], 256  }
 0x3cd   :  { %1760 = vsyncadd [#allocation4], 4294967040 }
 0x3ce   :  { %1292 = vsyncpa [#allocation3], 1 }
 0x3cf   :  { %1293 = vsyncpa [#allocation6], 1 }
 0x3d0   :  { %1294 = vsyncpa [#allocation9], 1 }
 0x3d1   :  { %1295 = vsyncpa [#allocation4], 1 }

</bundles_post_ra>
